<compile_context>
chip_gen: v6e
topology: v6e:2x2x1
jax: 0.10.0
libtpu: 0.0.40
codegen_flags: <defaults>
</compile_context>

<pallas_src>
import functools

import jax
import jax.numpy as jnp
from jax import lax
from jax.experimental import pallas as pl
from jax.experimental.pallas import tpu as pltpu


# ------------------------------ Pallas kernel ------------------------------ #

def _rope_kernel(x_ref, c_ref, s_ref, o_ref):
    """out = x * C + swap_pairs(x) * S  (interleaved RoPE pair rotation).

    x_ref / o_ref blocks are (1, seq_tile, d_k).  c_ref / s_ref are either
    (seq_tile, d_k)      -- positions shared across batch (tile reused across
                            the fast batch grid axis), or
    (1, seq_tile, d_k)   -- per-batch token positions.
    Both broadcast cleanly against x.
    """
    x = x_ref[...].astype(jnp.float32)          # (1, seq_tile, d_k)
    c = c_ref[...].astype(jnp.float32)
    s = s_ref[...].astype(jnp.float32)
    d = x.shape[-1]
    # Circular lane rolls: x_next[j] = x[(j+1) % d], x_prev[j] = x[(j-1) % d].
    x_next = pltpu.roll(x, d - 1, 2)
    x_prev = pltpu.roll(x, 1, 2)
    parity = lax.broadcasted_iota(jnp.int32, x.shape, 2) % 2
    # Swap adjacent pairs: even lanes take their odd neighbour and vice versa.
    x_swap = jnp.where(parity == 0, x_next, x_prev)
    o_ref[...] = (x * c + x_swap * s).astype(o_ref.dtype)


# ------------------------------ host wrappers ------------------------------ #

def make_rope_tables(theta, d_k, max_seq_len, dtype=jnp.float32):
    """Equivalent of the torch module's __init__ (the R buffer) as cos/sin tables."""
    assert d_k % 2 == 0, "d_k must be even for RoPE"
    half = d_k // 2
    k = jnp.arange(half, dtype=jnp.float32)
    inv_freq = 1.0 / (theta ** (2.0 * k / d_k))
    pos = jnp.arange(max_seq_len, dtype=jnp.float32)
    ang = pos[:, None] * inv_freq[None, :]                             # (max_seq, d_k//2)
    cos = jnp.cos(ang)
    sin = jnp.sin(ang)
    cos_t = jnp.repeat(cos, 2, axis=-1)                                # [c0,c0,c1,c1,...]
    sin_t = jnp.stack([-sin, sin], axis=-1).reshape(max_seq_len, d_k)  # [-s0,s0,-s1,s1,...]
    return cos_t.astype(dtype), sin_t.astype(dtype)


def _default_seq_tile(S, target=1024):
    """Largest divisor of S that is <= target and a multiple of 8 (else S)."""
    if S <= target:
        return S
    for t in range(target, 7, -1):
        if S % t == 0 and t % 8 == 0:
            return t
    return S


def apply_rope(x, cos_t, sin_t, token_positions=None, seq_tile=None,
               donate_x=False):
    """x: (batch, seq, d_k); cos_t/sin_t: (max_seq_len, d_k) tables.

    Matches RotaryPositionalEmbedding.forward.  token_positions may be None
    (positions 0..seq-1), shape (seq,) shared across batch, or shape
    (batch, seq) PyTorch-style per-batch positions.
    """
    B, S, D = x.shape
    assert D % 2 == 0
    # Note: for best store/DMA layout d_k should be a multiple of 128; for
    # d_k < 128 the caller should merge adjacent heads before calling.
    table_dtype = x.dtype  # bf16 tables for bf16 activations halves table bytes

    batched_pos = token_positions is not None and token_positions.ndim == 2
    if token_positions is not None:
        cos_sel = jnp.take(cos_t, token_positions, axis=0)   # (S,D) or (B,S,D)
        sin_sel = jnp.take(sin_t, token_positions, axis=0)
    else:
        cos_sel = lax.slice_in_dim(cos_t, 0, S, axis=0)      # (S, D)
        sin_sel = lax.slice_in_dim(sin_t, 0, S, axis=0)
    cos_sel = cos_sel.astype(table_dtype)
    sin_sel = sin_sel.astype(table_dtype)

    if seq_tile is None:
        seq_tile = _default_seq_tile(S)
    assert S % seq_tile == 0, "seq_tile must divide seq"

    # Grid: (seq tiles, batch) with batch as the FAST axis.  For shared
    # positions the cos/sin block index (s, 0) does not change across the fast
    # axis, so Pallas skips the re-DMA: tables are read once per seq tile.
    grid = (S // seq_tile, B)

    x_spec = pl.BlockSpec((1, seq_tile, D), lambda s, b: (b, s, 0))
    if batched_pos:
        tab_spec = pl.BlockSpec((1, seq_tile, D), lambda s, b: (b, s, 0))
    else:
        tab_spec = pl.BlockSpec((seq_tile, D), lambda s, b: (s, 0))

    # Per-step working set (x + out + cos + sin, double-buffered); raise the
    # scoped VMEM limit only when big tiles are requested (v5e default 16 MiB).
    itemsize = jnp.dtype(x.dtype).itemsize
    tab_itemsize = jnp.dtype(table_dtype).itemsize
    working = 2 * seq_tile * D * (2 * itemsize + 2 * tab_itemsize)
    compiler_kwargs = dict(dimension_semantics=("parallel", "parallel"))
    if working > (12 << 20):
        compiler_kwargs["vmem_limit_bytes"] = min(
            64 << 20, int(working * 1.5) + (4 << 20))

    return pl.pallas_call(
        _rope_kernel,
        out_shape=jax.ShapeDtypeStruct((B, S, D), x.dtype),
        grid=grid,
        in_specs=[x_spec, tab_spec, tab_spec],
        out_specs=pl.BlockSpec((1, seq_tile, D), lambda s, b: (b, s, 0)),
        compiler_params=pltpu.CompilerParams(**compiler_kwargs),
        input_output_aliases=({0: 0} if donate_x else {}),
    )(x, cos_sel, sin_sel)


# --------------------------- pure-JAX reference ----------------------------- #

def reference_rope(x, theta, positions):
    """Independent reference (same math as the torch rotation-matrix matmul)."""
    B, S, D = x.shape
    pos = jnp.broadcast_to(positions, (B, S)).astype(jnp.float32)
    k = jnp.arange(D // 2, dtype=jnp.float32)
    ang = pos[..., None] / (theta ** (2.0 * k / D))            # (B, S, D//2)
    cos, sin = jnp.cos(ang), jnp.sin(ang)
    x1 = x[..., 0::2]
    x2 = x[..., 1::2]
    r1 = x1 * cos - x2 * sin
    r2 = x1 * sin + x2 * cos
    return jnp.stack([r1, r2], axis=-1).reshape(B, S, D)


# --------------------------------- main ------------------------------------ #

if __name__ == "__main__":
    theta = 10000.0
    d_k = 128            # lane-dense head dim (multiple of 128)
    max_seq_len = 32
    batch, seq = 2, 16

    key = jax.random.PRNGKey(0)
    kx, kp, kpb = jax.random.split(key, 3)
    x = jax.random.normal(kx, (batch, seq, d_k), dtype=jnp.float32)

    cos_t, sin_t = make_rope_tables(theta, d_k, max_seq_len)
    rope = jax.jit(apply_rope, static_argnames=("seq_tile", "donate_x"))

    # 1) Default path (token_positions=None -> positions 0..seq-1).
    out = rope(x, cos_t, sin_t)
    jax.block_until_ready(out)
    ref = reference_rope(x, theta, jnp.arange(seq))
    assert out.shape == (batch, seq, d_k) and out.dtype == jnp.float32
    assert bool(jnp.all(jnp.isfinite(out)))
    assert bool(jnp.allclose(out, ref, rtol=1e-4, atol=1e-4))

    # 2) Explicit shared token_positions (shape (seq,)).
    positions = jax.random.randint(kp, (seq,), 0, max_seq_len, dtype=jnp.int32)
    out2 = rope(x, cos_t, sin_t, token_positions=positions)
    jax.block_until_ready(out2)
    ref2 = reference_rope(x, theta, positions)
    assert bool(jnp.allclose(out2, ref2, rtol=1e-4, atol=1e-4))

    # 3) PyTorch-style per-batch token_positions (shape (batch, seq)).
    positions_b = jax.random.randint(kpb, (batch, seq), 0, max_seq_len,
                                     dtype=jnp.int32)
    out3 = rope(x, cos_t, sin_t, token_positions=positions_b)
    jax.block_until_ready(out3)
    ref3 = reference_rope(x, theta, positions_b)
    assert bool(jnp.allclose(out3, ref3, rtol=1e-4, atol=1e-4))

    # 4) bf16 activations -> bf16 tables on the wire, f32 math in-kernel.
    x_bf = x.astype(jnp.bfloat16)
    out4 = rope(x_bf, cos_t, sin_t)
    jax.block_until_ready(out4)
    assert out4.dtype == jnp.bfloat16
    ref4 = reference_rope(x_bf.astype(jnp.float32), theta, jnp.arange(seq))
    assert bool(jnp.allclose(out4.astype(jnp.float32), ref4,
                             rtol=5e-2, atol=5e-2))

    # 5) In-place (aliased) variant.
    out5 = rope(x, cos_t, sin_t, donate_x=True)
    jax.block_until_ready(out5)
    assert bool(jnp.allclose(out5, ref, rtol=1e-4, atol=1e-4))

    print("KERNEL_OK")
</pallas_src>

<mosaic_0001>
module attributes {stable_mosaic.version = 11 : i64} {
  func.func @_rope_kernel(%arg0: i32, %arg1: i32, %arg2: memref<1x16x128xf32, #tpu.memory_space<vmem>>, %arg3: memref<16x128xf32, #tpu.memory_space<vmem>>, %arg4: memref<16x128xf32, #tpu.memory_space<vmem>>, %arg5: memref<1x16x128xf32, #tpu.memory_space<vmem>>) attributes {dimension_semantics = [#tpu.dimension_semantics<parallel>, #tpu.dimension_semantics<parallel>], iteration_bounds = array<i64: 1, 2>, scalar_prefetch = 0 : i64, scratch_operands = 0 : i64, tpu.core_type = #tpu.core_type<tc>, window_params = [{transform_indices = @transform_0, window_bounds = array<i64: 1, 16, 128>}, {transform_indices = @transform_1, window_bounds = array<i64: 16, 128>}, {transform_indices = @transform_2, window_bounds = array<i64: 16, 128>}, {transform_indices = @transform_3, window_bounds = array<i64: 1, 16, 128>}]} {
    %c0 = arith.constant 0 : index
    %c0_0 = arith.constant 0 : index
    %c0_1 = arith.constant 0 : index
    %0 = vector.load %arg2[%c0, %c0_0, %c0_1] : memref<1x16x128xf32, #tpu.memory_space<vmem>>, vector<1x16x128xf32>
    %c0_2 = arith.constant 0 : index
    %c0_3 = arith.constant 0 : index
    %1 = vector.load %arg3[%c0_2, %c0_3] : memref<16x128xf32, #tpu.memory_space<vmem>>, vector<16x128xf32>
    %c0_4 = arith.constant 0 : index
    %c0_5 = arith.constant 0 : index
    %2 = vector.load %arg4[%c0_4, %c0_5] : memref<16x128xf32, #tpu.memory_space<vmem>>, vector<16x128xf32>
    %c127_i32 = arith.constant 127 : i32
    %3 = tpu.dynamic_rotate %0 by %c127_i32 dim 2 : vector<1x16x128xf32>, i32 -> vector<1x16x128xf32>
    %c1_i32 = arith.constant 1 : i32
    %4 = tpu.dynamic_rotate %0 by %c1_i32 dim 2 : vector<1x16x128xf32>, i32 -> vector<1x16x128xf32>
    %5 = tpu.iota {dimensions = array<i32: 2>} : vector<1x16x128xi32>
    %c2_i32 = arith.constant 2 : i32
    %c0_i32 = arith.constant 0 : i32
    %6 = arith.cmpi eq, %c2_i32, %c0_i32 : i32
    %c1_i32_6 = arith.constant 1 : i32
    %7 = arith.select %6, %c1_i32_6, %c2_i32 : i32
    %8 = vector.broadcast %7 : i32 to vector<1x16x128xi32>
    %9 = arith.remsi %5, %8 : vector<1x16x128xi32>
    %c0_i32_7 = arith.constant 0 : i32
    %10 = vector.broadcast %c0_i32_7 : i32 to vector<1x16x128xi32>
    %11 = arith.cmpi ne, %9, %10 : vector<1x16x128xi32>
    %c0_i32_8 = arith.constant 0 : i32
    %12 = vector.broadcast %c0_i32_8 : i32 to vector<1x16x128xi32>
    %13 = arith.cmpi slt, %9, %12 : vector<1x16x128xi32>
    %c0_i32_9 = arith.constant 0 : i32
    %14 = arith.cmpi slt, %7, %c0_i32_9 : i32
    %15 = vector.broadcast %14 : i1 to vector<1x16x128xi1>
    %16 = vector.broadcast %15 : vector<1x16x128xi1> to vector<1x16x128xi1>
    %17 = arith.xori %13, %16 : vector<1x16x128xi1>
    %18 = arith.andi %17, %11 : vector<1x16x128xi1>
    %19 = vector.broadcast %7 : i32 to vector<1x16x128xi32>
    %20 = arith.addi %9, %19 : vector<1x16x128xi32>
    %21 = arith.select %18, %20, %9 : vector<1x16x128xi1>, vector<1x16x128xi32>
    %c0_i32_10 = arith.constant 0 : i32
    %22 = vector.broadcast %c0_i32_10 : i32 to vector<1x16x128xi32>
    %23 = arith.cmpi eq, %21, %22 : vector<1x16x128xi32>
    %24 = arith.select %23, %3, %4 : vector<1x16x128xi1>, vector<1x16x128xf32>
    %25 = vector.shape_cast %1 : vector<16x128xf32> to vector<1x16x128xf32>
    %26 = arith.mulf %0, %25 : vector<1x16x128xf32>
    %27 = vector.shape_cast %2 : vector<16x128xf32> to vector<1x16x128xf32>
    %28 = arith.mulf %24, %27 : vector<1x16x128xf32>
    %29 = arith.addf %26, %28 : vector<1x16x128xf32>
    %c0_11 = arith.constant 0 : index
    %c0_12 = arith.constant 0 : index
    %c0_13 = arith.constant 0 : index
    %30 = vector.load %arg5[%c0_11, %c0_12, %c0_13] : memref<1x16x128xf32, #tpu.memory_space<vmem>>, vector<1x16x128xf32>
    tpu.vector_store %arg5[%c0_11, %c0_12, %c0_13], %29 {strides = array<i32>} : memref<1x16x128xf32, #tpu.memory_space<vmem>>, vector<1x16x128xf32>,
    return
  }
  func.func @transform_0(%arg0: i32, %arg1: i32) -> (i32, i32, i32) {
    %c0_i32 = arith.constant 0 : i32
    %c0_i32_0 = arith.constant 0 : i32
    return %arg1, %arg0, %c0_i32 : i32, i32, i32
  }
  func.func @transform_1(%arg0: i32, %arg1: i32) -> (i32, i32) {
    %c0_i32 = arith.constant 0 : i32
    %c0_i32_0 = arith.constant 0 : i32
    return %arg0, %c0_i32 : i32, i32
  }
  func.func @transform_2(%arg0: i32, %arg1: i32) -> (i32, i32) {
    %c0_i32 = arith.constant 0 : i32
    %c0_i32_0 = arith.constant 0 : i32
    return %arg0, %c0_i32 : i32, i32
  }
  func.func @transform_3(%arg0: i32, %arg1: i32) -> (i32, i32, i32) {
    %c0_i32 = arith.constant 0 : i32
    %c0_i32_0 = arith.constant 0 : i32
    return %arg1, %arg0, %c0_i32 : i32, i32, i32
  }
}

</mosaic_0001>

<bundles_post_ra>
// kernel: apply_rope.1
= control target key start
LH: loop header
LB: loop body
LE: loop exit
PB: predicated region body
PF: predicated region fallthrough
CT: control target
= control target key end

     0   :  { %8 = vsyncpa [#allocation3], 0  ;;  %s721_s0 = inlined_call_operand.vmem [shape: f32[2,16,128], index: 0, kind: input, shape index: {}]   ;;  %s722_s1 = inlined_call_operand.vmem [shape: f32[16,128], index: 1, kind: input, shape index: {}]   ;;  %s723_s2 = inlined_call_operand.vmem [shape: f32[16,128], index: 2, kind: input, shape index: {}]   ;;  %s724_s3 = inlined_call_operand.hbm [shape: f32[2,16,128], index: 3, kind: output, shape index: {}]  }
   0x1   :  { %10 = vsyncpa [#allocation3 + $0x1], 0  ;;  %s587_s12 = smov 0   ;;  %s589_s13 = smov 0  }
   0x2   :  { %s591_s14 = smov 0   ;;  %s593_s15 = smov 0  }
   0x3   :  { %s595_s16 = smov 0   ;;  %s597_s17 = smov 0  }
   0x4 LB: > { %s408_s18 = sadd.s32 4294967295, %s560_s17   ;;  %s409_s19 = sadd.s32 4294967294, %s560_s17   ;;  %s560_s17 = sphi %s597_s17, %s16_s17   ;;  %s556_s16 = sphi %s595_s16, %s733_s16   ;;  %s552_s15 = sphi %s593_s15, %s732_s15   ;;  %s548_s14 = sphi %s591_s14, %s731_s14   ;;  %s544_s13 = sphi %s589_s13, %s730_s13   ;;  %s540_s12 = sphi %s587_s12, %s729_s12  }
   0x5   : > { %s25_s20 = sadd.s32 1, %s556_s16  ;;  %s117_s21 = sadd.s32 1, %s548_s14 }
   0x6   : > { %p26_p0 = scmp.ge.s32.totalorder %s25_s20, 2  ;;  %p127_p1 = scmp.ne.s32.totalorder %s548_s14, %s544_s13 }
   0x7   : > { %p128_p2 = scmp.eq.s32.totalorder %s408_s18, 1  ;;  %p133_p3 = scmp.ne.s32.totalorder %s544_s13, %s540_s12 }
   0x8   : > { %s735_s20 = smov (%p26_p0, %s25_s20), 0  ;;  %p134_p5 = scmp.eq.s32.totalorder %s409_s19, 1 }
   0x9   : > { %p627_p4 = por %p128_p2, %p127_p1  ;;  %s112_s23 = ssub.s32 %s556_s16, %s735_s20 }
   0xa   : > { %p414_p6 = scmp.ge.s32.totalorder %s560_s17, 1  ;;  %p115_p7 = scmp.eq.s32.totalorder %s112_s23, 0 }
   0xb   : > { %p634_p8 = por %p134_p5, %p133_p3  ;;  %p183_p9 = scmp.lt.s32.totalorder %s560_s17, 3 }
   0xc   : > { %s640_s25 = scalar_select %p115_p7, %s548_s14, %s117_s21  }
   0xd   : > { %p184_p10 = pnand %p414_p6, %p183_p9 }
   0xe   : > { %p222_p11 = scmp.lt.s32.totalorder (!%p184_p10), %s552_s15, 1  ;;  %s562_s4 = smov (!%p184_p10), 1  }
   0xf   : > { %187 = sbr.rel (%p184_p10) target bundleno = 163 (0xa3), region = 32  ;;  %s563_s5 = smov (!%p184_p10), 127  }
  0x10   : > { %s218_s8 = sand.u32 (!%p184_p10), 1, %s544_s13   ;;  %s424_s28 = sshll.u32 (!%p184_p10), %s552_s15, 8 }
  0x11   : > { %s415_s11 = sshll.u32 (!%p184_p10), %s218_s8, 4  ;;  %s564_s6 = smov (!%p184_p10), [#allocation2]  }
  0x12   : > { %s488_s7 = sshll.u32 (!%p184_p10), %s564_s6, 4  ;;  %s489_s7 = int_to_ptr.vmem [resolvable:$false] %s488_s7 }
  0x13   : > { %s490_s9 = scalar_lea.vmem (!%p184_p10), %s489_s7, 512 }
  0x14   : > { %s223_s26 = scalar_select %p222_p11, %s552_s15, 1  ;;  %v258_v2 = vlaneseq  ;;  %v246_v5 = vld [vmem:[%s722_s1] sm:$0xff]  ;;  %v247_v11 = vld [vmem:[%s722_s1 + $0x8] sm:$0xff] }
  0x15   : > { %v248_v7 = vld [vmem:[%s723_s2] sm:$0xff]  ;;  %v249_v14 = vld [vmem:[%s723_s2 + $0x8] sm:$0xff] }
  0x16   : > { %s423_s27 = sshll.u32 %s223_s26, 4  ;;  %v259_v3 = vand.u32 127, %v258_v2  ;;  %s220_s26 = scalar_lea.vmem [#allocation2], %s415_s11 }
  0x17   : > { %s229_s30 = scalar_lea.vmem %s721_s0, %s423_s27  ;;  %s299_s27 = sshll.u32 %s220_s26, 4  ;;  %s669_s27 = int_to_ptr.vmem [resolvable:$true] %s299_s27 }
  0x18   : > { %v244_v0 = vld [vmem:[%s229_s30] sm:$0xff]  ;;  %v245_v1 = vld [vmem:[%s229_s30 + $0x8] sm:$0xff]  ;;  %v264_v4 = vand.u32 1, %v259_v3  ;;  %s484_s15 = scalar_lea.vmem %s669_s27, 256  ;;  %p491_p1 = scmp.lt.s32.totalorder %s669_s27, %s489_s7 }
  0x19   : > { %254 = vrot.lane.b32.xlu1 %v244_v0, %s562_s4  ;;  %250 = vrot.lane.b32.xlu0 %v244_v0, %s563_s5  ;;  %v275_v8 = vmul.f32 %v246_v5, %v244_v0  ;;  %v276_v15 = vmul.f32 %v247_v11, %v245_v1  ;;  %p485_p12 = scmp.ne.s32.totalorder %s669_s27, %s484_s15  ;;  %p492_p2 = scmp.lt.s32.totalorder %s490_s9, %s484_s15 }
  0x1a   : > { %vm651_vm0 = vcmp.eq.s32.totalorder %v264_v4, 0 }
  0x1b   : > { %p486_p13 = pnand %p485_p12, %p627_p4  ;;  %p493_p3 = por %p492_p2, %p491_p1 }
  0x1d   : > { %256 = vrot.lane.b32.xlu1 %v245_v1, %s562_s4  ;;  %252 = vrot.lane.b32.xlu0 %v245_v1, %s563_s5  ;;  %s674_s4 = scalar_lea.hbm %s724_s3, %s424_s28  ;;  %s676_s5 = scalar_lea.sflag [#allocation3], %s218_s8 }
  0x1e   : > { %p487_p0 = pneg %p486_p13 }
  0x20   : > { %p494_p5 = pnand %p493_p3, %p487_p0 }
  0x8b   : > { %v255_v9 = vpop.permute.xlu1 %254  ;;  %v251_v10 = vpop.permute.xlu0 %250 }
  0x8c   : > { %v273_v12 = vsel %vm651_vm0, %v251_v10, %v255_v9 }
  0x8d   : > { %v277_v13 = vmul.f32 %v273_v12, %v248_v7 }
  0x8f   : > { %v279_v16 = vadd.f32 %v277_v13, %v275_v8  ;;  %v257_v17 = vpop.permute.xlu1 %256  ;;  %v253_v18 = vpop.permute.xlu0 %252 }
  0x90   : > { %v274_v19 = vsel %vm651_vm0, %v253_v18, %v257_v17 }
  0x91   : > { %281 = vst [vmem:[%s220_s26] sm:$0xff] %v279_v16  ;;  %v278_v20 = vmul.f32 %v274_v19, %v249_v14 }
  0x93   : > { %v280_v21 = vadd.f32 %v278_v20, %v276_v15 }
  0x95   : > { %282 = vst [vmem:[%s220_s26 + $0x8] sm:$0xff] %v280_v21 }
  0x96   : > { %497 = shalt.err (!%p494_p5)
}
  0x97   : > { %s498_s8 = scalar_lea.hbm %s674_s4, 256  ;;  %s502_s18 = scalar_lea.hbm %s724_s3, 512 }
  0x98   : > { %p499_p6 = scmp.ne.s32.totalorder %s674_s4, %s498_s8  ;;  %p503_p10 = scmp.lt.s32.totalorder %s674_s4, %s724_s3 }
  0x99   : > { %p504_p11 = scmp.lt.s32.totalorder %s502_s18, %s498_s8 }
  0x9a   : > { %p500_p7 = pnand %p499_p6, %p627_p4 }
  0x9b   : > { %p505_p12 = por %p504_p11, %p503_p10 }
  0x9c   : > { %p501_p9 = pneg %p500_p7 }
  0x9e   : > { %p506_p13 = pnand %p505_p12, %p501_p9 }
  0xa0   : > { %509 = shalt.err (!%p506_p13)
}
  0xa1   : > { %s565_s23 = smov 128   ;;  %s566_s26 = smov 8  }
  0xa2   : > { %425 = dma.vmem_to_hbm [thread:$0]  (%p627_p4), %s669_s27, 256, %s674_s4, %s676_s5, %s565_s23, %s565_s23, %s566_s26  }
  0xa3 PF: > { %p431_p0 = scmp.ge.s32.totalorder %s560_s17, 2  ;;  %s314_s28 = sand.u32 1, %s540_s12  }
  0xa4   : > { %s315_s29 = scalar_lea.sflag [#allocation3], %s314_s28 }
  0xa5   : > { %p428_p1 = pnand %p431_p0, %p634_p8 }
  0xa7   : > { %p429_p2 = pneg %p428_p1 }
  0xa9   : > { %535 = dma.done.wait (%p429_p2), %s315_s29, 256  }
  0xaa   : > { %537 = vsyncadd (%p429_p2), %s315_s29, 4294967040  ;;  %s16_s17 = sadd.s32 1, %s560_s17   ;;  %s729_s12 = smov %s544_s13 }
  0xab   : > { %p13_p3 = scmp.ge.s32.totalorder %s16_s17, 4   ;;  %s730_s13 = smov %s548_s14 }
  0xac   : > { %s731_s14 = smov %s640_s25  ;;  %s732_s15 = smov %s556_s16 }
  0xad   : > { %s733_s16 = smov %s735_s20  ;;  %15 = sbr.rel (!%p13_p3) target bundleno = 4 (0x4), region = 73 }
  0xb2   :  { %320 = vsyncpa [#allocation3], 1 }
  0xb3   :  { %322 = vsyncpa [#allocation3 + $0x1], 1 }

</bundles_post_ra>
